<compile_context>
chip_gen: v6e
topology: v6e:2x2x1
jax: 0.10.0
libtpu: 0.0.40
codegen_flags: <defaults>
</compile_context>

<pallas_src>
import functools
import math

import jax
import jax.numpy as jnp
from jax.experimental import pallas as pl
from jax.experimental.pallas import tpu as pltpu


LANE = 128      # lane width: last dim of every block is padded to a multiple
SUBLANE = 8     # f32 sublane granularity for the batch axis


def _round_up(x, m):
    return ((x + m - 1) // m) * m


def _pad2d(a, rows, cols):
    r, c = a.shape
    if r == rows and c == cols:
        return a
    return jnp.pad(a, ((0, rows - r), (0, cols - c)))


def _choose_tm(m):
    """Batch tile size: MXU-friendly for big batches, >=2 grid steps when possible."""
    m8 = _round_up(m, SUBLANE)
    if m8 >= 256:
        return 128
    # Medium batches: two grid steps so v7x's second TensorCore gets work.
    if m8 >= 2 * SUBLANE and (m8 // 2) % SUBLANE == 0:
        return m8 // 2
    return m8


# ----------------------------------------------------------------------------
# Fused kernel: all (Linear -> ReLU) layers in one body.
#   x_ref              : (tm, Kp)        bf16 input tile
#   refs[2l], refs[2l+1]: (in_p, out_p) bf16 weight, (1, out_p) f32 bias
#   refs[2L]           : (tm, out_p)     f32 output tile
# The layer loop is a static Python loop; intermediates live in vregs/VMEM
# (compiler-managed), so no HBM traffic between layers.
# ----------------------------------------------------------------------------
def _make_fused_encoder_kernel(n_layers):
    def kernel(x_ref, *refs):
        o_ref = refs[2 * n_layers]
        h = x_ref[...]                                    # bf16 (tm, Kp)
        for l in range(n_layers):
            w = refs[2 * l][...]                          # bf16 (in_p, out_p)
            b = refs[2 * l + 1][...]                      # f32  (1, out_p)
            y = jnp.dot(h, w, preferred_element_type=jnp.float32)
            y = jnp.maximum(y + b, 0.0)                   # bias + ReLU in f32
            if l + 1 < n_layers:
                h = y.astype(w.dtype)                     # back to bf16 for MXU
            else:
                o_ref[...] = y.astype(o_ref.dtype)
    return kernel


def encoder_forward(x, params, *, matmul_dtype=jnp.bfloat16):
    """Fused Encoder forward: x [M, input_dim] -> [M, hidden_dim]."""
    n_layers = len(params)
    if n_layers == 0:
        return x

    M, K = x.shape
    dims = [K] + [w.shape[1] for (w, _) in params]
    outs_p = [_round_up(d, LANE) for d in dims[1:]]
    ins_p = [_round_up(K, LANE)] + outs_p[:-1]

    tm = _choose_tm(M)
    Mp = _round_up(M, tm)

    # Pad + cast: activations/weights -> bf16 for the MXU, biases stay f32.
    x_p = _pad2d(x, Mp, ins_p[0]).astype(matmul_dtype)
    flat_wb = []
    for l, (w, b) in enumerate(params):
        wp = _pad2d(w, ins_p[l], outs_p[l]).astype(matmul_dtype)
        bp = _pad2d(b.reshape(1, -1), 1, outs_p[l]).astype(jnp.float32)
        flat_wb += [wp, bp]

    grid = (Mp // tm,)
    in_specs = [pl.BlockSpec((tm, ins_p[0]), lambda i: (i, 0))]
    for l in range(n_layers):
        in_specs.append(pl.BlockSpec((ins_p[l], outs_p[l]), lambda i: (0, 0)))
        in_specs.append(pl.BlockSpec((1, outs_p[l]), lambda i: (0, 0)))
    out_spec = pl.BlockSpec((tm, outs_p[-1]), lambda i: (i, 0))

    flops = 2 * Mp * sum(ins_p[l] * outs_p[l] for l in range(n_layers))
    bytes_accessed = int(
        x_p.size * x_p.dtype.itemsize
        + sum(a.size * a.dtype.itemsize for a in flat_wb)
        + Mp * outs_p[-1] * 4
    )
    cost = pl.CostEstimate(flops=flops, transcendentals=0,
                           bytes_accessed=bytes_accessed)

    out_p = pl.pallas_call(
        _make_fused_encoder_kernel(n_layers),
        out_shape=jax.ShapeDtypeStruct((Mp, outs_p[-1]), jnp.float32),
        grid_spec=pltpu.PrefetchScalarGridSpec(
            num_scalar_prefetch=0,
            grid=grid,
            in_specs=in_specs,
            out_specs=out_spec,
        ),
        compiler_params=pltpu.CompilerParams(
            dimension_semantics=("parallel",),   # batch tiles shard across TCs
            vmem_limit_bytes=64 * 1024 * 1024,   # fits v7x's 64 MiB VMEM
        ),
        cost_estimate=cost,
    )(x_p, *flat_wb)

    return out_p[:M, :dims[-1]]


# ----------------------------------------------------------------------------
# Parameter construction (matches nn.Linear default U(-1/sqrt(fan_in), ...)).
# ----------------------------------------------------------------------------
def init_encoder_params(key, input_dim, hidden_dim, hidden_layers,
                        dtype=jnp.float32):
    layers = [input_dim] + [hidden_dim] * hidden_layers
    params = []
    for i in range(len(layers) - 1):
        fan_in, fan_out = layers[i], layers[i + 1]
        key, kw, kb = jax.random.split(key, 3)
        bound = 1.0 / math.sqrt(fan_in)
        w = jax.random.uniform(kw, (fan_in, fan_out), dtype,
                               minval=-bound, maxval=bound)   # [in, out]
        b = jax.random.uniform(kb, (1, fan_out), dtype,
                               minval=-bound, maxval=bound)
        params.append((w, b))
    return params


# Pure-JAX references for sanity checks.
def encoder_forward_ref(x, params, *, matmul_dtype=jnp.float32):
    h = x
    for (w, b) in params:
        y = jnp.dot(h.astype(matmul_dtype), w.astype(matmul_dtype),
                    preferred_element_type=jnp.float32)
        h = jnp.maximum(y + b.astype(jnp.float32), 0.0)
    return h


if __name__ == "__main__":
    key = jax.random.PRNGKey(0)
    k_x, k_p = jax.random.split(key)

    batch = 8
    input_dim = 16
    hidden_dim = 32
    hidden_layers = 3

    x = jax.random.normal(k_x, (batch, input_dim), jnp.float32)
    params = init_encoder_params(k_p, input_dim, hidden_dim, hidden_layers)

    fwd = jax.jit(encoder_forward)
    out = jax.block_until_ready(fwd(x, params))

    # Reference with the same bf16-matmul / f32-accumulate recipe (tight check)
    ref_bf16 = encoder_forward_ref(x, params, matmul_dtype=jnp.bfloat16)
    # Full-f32 reference = exact semantics of the PyTorch module (loose check)
    ref_f32 = encoder_forward_ref(x, params, matmul_dtype=jnp.float32)

    assert out.shape == (batch, hidden_dim), out.shape
    assert jnp.allclose(out, ref_bf16, atol=2e-3, rtol=2e-3), \
        "mismatch vs bf16-matched reference"
    assert jnp.allclose(out, ref_f32, atol=1e-1, rtol=1e-1), \
        "mismatch vs f32 reference"

    print("KERNEL_OK")
</pallas_src>

<mosaic_0001>
module attributes {stable_mosaic.version = 11 : i64} {
  func.func @kernel(%arg0: i32, %arg1: memref<8x128xbf16, #tpu.memory_space<vmem>>, %arg2: memref<128x128xbf16, #tpu.memory_space<vmem>>, %arg3: memref<1x128xf32, #tpu.memory_space<vmem>>, %arg4: memref<128x128xbf16, #tpu.memory_space<vmem>>, %arg5: memref<1x128xf32, #tpu.memory_space<vmem>>, %arg6: memref<128x128xbf16, #tpu.memory_space<vmem>>, %arg7: memref<1x128xf32, #tpu.memory_space<vmem>>, %arg8: memref<8x128xf32, #tpu.memory_space<vmem>>) attributes {dimension_semantics = [#tpu.dimension_semantics<parallel>], iteration_bounds = array<i64: 1>, scalar_prefetch = 0 : i64, scratch_operands = 0 : i64, tpu.core_type = #tpu.core_type<tc>, window_params = [{transform_indices = @transform_0, window_bounds = array<i64: 8, 128>}, {pipeline_mode = #tpu.pipeline_mode<synchronous>, transform_indices = @transform_1, window_bounds = array<i64: 128, 128>}, {pipeline_mode = #tpu.pipeline_mode<synchronous>, transform_indices = @transform_2, window_bounds = array<i64: 1, 128>}, {pipeline_mode = #tpu.pipeline_mode<synchronous>, transform_indices = @transform_3, window_bounds = array<i64: 128, 128>}, {pipeline_mode = #tpu.pipeline_mode<synchronous>, transform_indices = @transform_4, window_bounds = array<i64: 1, 128>}, {pipeline_mode = #tpu.pipeline_mode<synchronous>, transform_indices = @transform_5, window_bounds = array<i64: 128, 128>}, {pipeline_mode = #tpu.pipeline_mode<synchronous>, transform_indices = @transform_6, window_bounds = array<i64: 1, 128>}, {transform_indices = @transform_7, window_bounds = array<i64: 8, 128>}]} {
    %c0 = arith.constant 0 : index
    %c0_0 = arith.constant 0 : index
    %0 = vector.load %arg1[%c0, %c0_0] : memref<8x128xbf16, #tpu.memory_space<vmem>>, vector<8x128xbf16>
    %c0_1 = arith.constant 0 : index
    %c0_2 = arith.constant 0 : index
    %1 = vector.load %arg2[%c0_1, %c0_2] : memref<128x128xbf16, #tpu.memory_space<vmem>>, vector<128x128xbf16>
    %c0_3 = arith.constant 0 : index
    %c0_4 = arith.constant 0 : index
    %2 = vector.load %arg3[%c0_3, %c0_4] : memref<1x128xf32, #tpu.memory_space<vmem>>, vector<1x128xf32>
    %cst = arith.constant dense<0.000000e+00> : vector<8x128xf32>
    %3 = tpu.matmul %0, %1, %cst {dimension_numbers = #tpu.dot_dimension_numbers<[1], [0], [0], [1], [0, 0, 1, 1], [], []>} : vector<8x128xbf16>, vector<128x128xbf16>, vector<8x128xf32> -> vector<8x128xf32>
    %4 = vector.broadcast %2 : vector<1x128xf32> to vector<8x128xf32>
    %5 = arith.addf %3, %4 : vector<8x128xf32>
    %cst_5 = arith.constant 0.000000e+00 : f32
    %6 = vector.broadcast %cst_5 : f32 to vector<8x128xf32>
    %7 = arith.maximumf %5, %6 : vector<8x128xf32>
    %8 = arith.truncf %7 : vector<8x128xf32> to vector<8x128xbf16>
    %c0_6 = arith.constant 0 : index
    %c0_7 = arith.constant 0 : index
    %9 = vector.load %arg4[%c0_6, %c0_7] : memref<128x128xbf16, #tpu.memory_space<vmem>>, vector<128x128xbf16>
    %c0_8 = arith.constant 0 : index
    %c0_9 = arith.constant 0 : index
    %10 = vector.load %arg5[%c0_8, %c0_9] : memref<1x128xf32, #tpu.memory_space<vmem>>, vector<1x128xf32>
    %cst_10 = arith.constant dense<0.000000e+00> : vector<8x128xf32>
    %11 = tpu.matmul %8, %9, %cst_10 {dimension_numbers = #tpu.dot_dimension_numbers<[1], [0], [0], [1], [0, 0, 1, 1], [], []>} : vector<8x128xbf16>, vector<128x128xbf16>, vector<8x128xf32> -> vector<8x128xf32>
    %12 = vector.broadcast %10 : vector<1x128xf32> to vector<8x128xf32>
    %13 = arith.addf %11, %12 : vector<8x128xf32>
    %cst_11 = arith.constant 0.000000e+00 : f32
    %14 = vector.broadcast %cst_11 : f32 to vector<8x128xf32>
    %15 = arith.maximumf %13, %14 : vector<8x128xf32>
    %16 = arith.truncf %15 : vector<8x128xf32> to vector<8x128xbf16>
    %c0_12 = arith.constant 0 : index
    %c0_13 = arith.constant 0 : index
    %17 = vector.load %arg6[%c0_12, %c0_13] : memref<128x128xbf16, #tpu.memory_space<vmem>>, vector<128x128xbf16>
    %c0_14 = arith.constant 0 : index
    %c0_15 = arith.constant 0 : index
    %18 = vector.load %arg7[%c0_14, %c0_15] : memref<1x128xf32, #tpu.memory_space<vmem>>, vector<1x128xf32>
    %cst_16 = arith.constant dense<0.000000e+00> : vector<8x128xf32>
    %19 = tpu.matmul %16, %17, %cst_16 {dimension_numbers = #tpu.dot_dimension_numbers<[1], [0], [0], [1], [0, 0, 1, 1], [], []>} : vector<8x128xbf16>, vector<128x128xbf16>, vector<8x128xf32> -> vector<8x128xf32>
    %20 = vector.broadcast %18 : vector<1x128xf32> to vector<8x128xf32>
    %21 = arith.addf %19, %20 : vector<8x128xf32>
    %cst_17 = arith.constant 0.000000e+00 : f32
    %22 = vector.broadcast %cst_17 : f32 to vector<8x128xf32>
    %23 = arith.maximumf %21, %22 : vector<8x128xf32>
    %c0_18 = arith.constant 0 : index
    %c0_19 = arith.constant 0 : index
    %24 = vector.load %arg8[%c0_18, %c0_19] : memref<8x128xf32, #tpu.memory_space<vmem>>, vector<8x128xf32>
    tpu.vector_store %arg8[%c0_18, %c0_19], %23 {strides = array<i32>} : memref<8x128xf32, #tpu.memory_space<vmem>>, vector<8x128xf32>,
    return
  }
  func.func @transform_0(%arg0: i32) -> (i32, i32) {
    %c0_i32 = arith.constant 0 : i32
    %c0_i32_0 = arith.constant 0 : i32
    return %arg0, %c0_i32 : i32, i32
  }
  func.func @transform_1(%arg0: i32) -> (i32, i32) {
    %c0_i32 = arith.constant 0 : i32
    %c0_i32_0 = arith.constant 0 : i32
    %c0_i32_1 = arith.constant 0 : i32
    return %c0_i32, %c0_i32_0 : i32, i32
  }
  func.func @transform_2(%arg0: i32) -> (i32, i32) {
    %c0_i32 = arith.constant 0 : i32
    %c0_i32_0 = arith.constant 0 : i32
    %c0_i32_1 = arith.constant 0 : i32
    return %c0_i32, %c0_i32_0 : i32, i32
  }
  func.func @transform_3(%arg0: i32) -> (i32, i32) {
    %c0_i32 = arith.constant 0 : i32
    %c0_i32_0 = arith.constant 0 : i32
    %c0_i32_1 = arith.constant 0 : i32
    return %c0_i32, %c0_i32_0 : i32, i32
  }
  func.func @transform_4(%arg0: i32) -> (i32, i32) {
    %c0_i32 = arith.constant 0 : i32
    %c0_i32_0 = arith.constant 0 : i32
    %c0_i32_1 = arith.constant 0 : i32
    return %c0_i32, %c0_i32_0 : i32, i32
  }
  func.func @transform_5(%arg0: i32) -> (i32, i32) {
    %c0_i32 = arith.constant 0 : i32
    %c0_i32_0 = arith.constant 0 : i32
    %c0_i32_1 = arith.constant 0 : i32
    return %c0_i32, %c0_i32_0 : i32, i32
  }
  func.func @transform_6(%arg0: i32) -> (i32, i32) {
    %c0_i32 = arith.constant 0 : i32
    %c0_i32_0 = arith.constant 0 : i32
    %c0_i32_1 = arith.constant 0 : i32
    return %c0_i32, %c0_i32_0 : i32, i32
  }
  func.func @transform_7(%arg0: i32) -> (i32, i32) {
    %c0_i32 = arith.constant 0 : i32
    %c0_i32_0 = arith.constant 0 : i32
    return %arg0, %c0_i32 : i32, i32
  }
}

</mosaic_0001>

<bundles_post_ra>
// kernel: encoder_forward.1
= control target key start
LH: loop header
LB: loop body
LE: loop exit
PB: predicated region body
PF: predicated region fallthrough
CT: control target
= control target key end

     0   :  { %v545_v1 = vmov 0.0   ;;  %vm546_vm0 = vmmov 0   ;;  %s705_s0 = inlined_call_operand.vmem [shape: bf16[8,128], index: 0, kind: input, shape index: {}]   ;;  %s706_s1 = inlined_call_operand.vmem [shape: bf16[128,128], index: 1, kind: input, shape index: {}]   ;;  %s707_s2 = inlined_call_operand.vmem [shape: f32[1,128], index: 2, kind: input, shape index: {}]   ;;  %s708_s3 = inlined_call_operand.vmem [shape: bf16[128,128], index: 3, kind: input, shape index: {}]   ;;  %s709_s4 = inlined_call_operand.vmem [shape: f32[1,128], index: 4, kind: input, shape index: {}]   ;;  %s710_s5 = inlined_call_operand.vmem [shape: bf16[128,128], index: 5, kind: input, shape index: {}]   ;;  %s711_s6 = inlined_call_operand.vmem [shape: f32[1,128], index: 6, kind: input, shape index: {}]   ;;  %s712_s7 = inlined_call_operand.hbm [shape: f32[8,128], index: 7, kind: output, shape index: {}]  }
   0x1   :  { %v499_v0 = vld [vmem:[%s706_s1 + $0x38] sm:$0xff]   ;;  %436 = vmatprep.subr.bf16.mxu0 %v545_v1  ;;  %456 = vmatprep.subr.bf16.mxu1 %v545_v1  ;;  %v500_v2 = vld [vmem:[%s706_s1 + $0x30] sm:$0xff]   ;;  %v501_v3 = vld [vmem:[%s706_s1 + $0x28] sm:$0xff]  }
   0x2   :  { %437 = vmatpush3.bf16.msra.mxu0 %v499_v0  ;;  %452 = vmatprep.mubr.msk.bf16.mxu0 %vm546_vm0, %v545_v1  ;;  %v507_v4 = vld [vmem:[%s708_s3 + $0x38] sm:$0xff]   ;;  %v502_v5 = vld [vmem:[%s706_s1 + $0x20] sm:$0xff]   ;;  %v508_v6 = vld [vmem:[%s708_s3 + $0x30] sm:$0xff]  }
   0x3   :  { %438 = vmatprep.subr.bf16.mxu0 %v545_v1  ;;  %472 = vmatprep.mubr.msk.bf16.mxu1 %vm546_vm0, %v545_v1  ;;  %v503_v7 = vld [vmem:[%s706_s1 + $0x18] sm:$0xff]   ;;  %v509_v8 = vld [vmem:[%s708_s3 + $0x28] sm:$0xff]   ;;  %v504_v9 = vld [vmem:[%s706_s1 + $0x10] sm:$0xff]  }
   0x4   :  { %457 = vmatpush3.bf16.msra.mxu1 %v507_v4  ;;  %v510_v10 = vld [vmem:[%s708_s3 + $0x20] sm:$0xff]  }
   0x5   :  { %458 = vmatprep.subr.bf16.mxu1 %v545_v1 }
   0x6   :  { %439 = vmatpush3.bf16.msra.mxu0 %v500_v2 }
   0x7   :  { %440 = vmatprep.subr.bf16.mxu0 %v545_v1 }
   0x8   :  { %459 = vmatpush3.bf16.msra.mxu1 %v508_v6 }
   0x9   :  { %460 = vmatprep.subr.bf16.mxu1 %v545_v1 }
   0xa   :  { %441 = vmatpush3.bf16.msra.mxu0 %v501_v3 }
   0xb   :  { %442 = vmatprep.subr.bf16.mxu0 %v545_v1 }
   0xc   :  { %461 = vmatpush3.bf16.msra.mxu1 %v509_v8 }
   0xd   :  { %462 = vmatprep.subr.bf16.mxu1 %v545_v1 }
   0xe   :  { %443 = vmatpush3.bf16.msra.mxu0 %v502_v5 }
   0xf   :  { %444 = vmatprep.subr.bf16.mxu0 %v545_v1 }
  0x12   :  { %445 = vmatpush3.bf16.msra.mxu0 %v503_v7 }
  0x13   :  { %446 = vmatprep.subr.bf16.mxu0 %v545_v1 }
  0x14   :  { %12 = vsyncpa [#allocation3], 0  ;;  %v505_v11 = vld [vmem:[%s706_s1 + $0x8] sm:$0xff]   ;;  %463 = vmatpush3.bf16.msra.mxu1 %v510_v10  ;;  %v511_v12 = vld [vmem:[%s708_s3 + $0x18] sm:$0xff]   ;;  %s547_s30 = smov [#allocation2]  }
  0x15   :  { %464 = vmatprep.subr.bf16.mxu1 %v545_v1  ;;  %v506_v13 = vld [vmem:[%s706_s1] sm:$0xff]   ;;  %v512_v14 = vld [vmem:[%s708_s3 + $0x10] sm:$0xff]   ;;  %v513_v16 = vld [vmem:[%s708_s3 + $0x8] sm:$0xff]  }
  0x16   :  { %447 = vmatpush3.bf16.msra.mxu0 %v504_v9  ;;  %v28_v15 = vld [vmem:[%s705_s0] sm:$0xf]  ;;  %v515_v18 = vld [vmem:[%s710_s5 + $0x38] sm:$0xff]   ;;  %v516_v19 = vld [vmem:[%s710_s5 + $0x30] sm:$0xff]  }
  0x17   :  { %448 = vmatprep.subr.bf16.mxu0 %v545_v1  ;;  %v514_v17 = vld [vmem:[%s708_s3] sm:$0xff]   ;;  %v517_v20 = vld [vmem:[%s710_s5 + $0x28] sm:$0xff]   ;;  %v519_v22 = vld [vmem:[%s710_s5 + $0x18] sm:$0xff]  }
  0x18   :  { %465 = vmatpush3.bf16.msra.mxu1 %v511_v12  ;;  %v518_v21 = vld [vmem:[%s710_s5 + $0x20] sm:$0xff]   ;;  %v520_v23 = vld [vmem:[%s710_s5 + $0x10] sm:$0xff]   ;;  %v521_v32 = vld [vmem:[%s710_s5 + $0x8] sm:$0xff]  }
  0x19   :  { %466 = vmatprep.subr.bf16.mxu1 %v545_v1  ;;  %v382_v24 = vld [vmem:[%s707_s2] ss:$0 sm:$0xff] }
  0x1a   :  { %449 = vmatpush3.bf16.msra.mxu0 %v505_v11  ;;  %v522_v33 = vld [vmem:[%s710_s5] sm:$0xff]   ;;  %s374_s5 = sshll.u32 %s547_s30, 4  ;;  %s375_s5 = int_to_ptr.vmem [resolvable:$true] %s374_s5 }
  0x1b   :  { %450 = vmatprep.subr.bf16.mxu0 %v545_v1  ;;  %v391_v34 = vld [vmem:[%s709_s4] ss:$0 sm:$0xff]  ;;  %s523_s4 = scalar_lea.vmem %s375_s5, 128  ;;  %p528_p1 = scmp.lt.s32.totalorder %s375_s5, %s375_s5 }
  0x1c   :  { %467 = vmatpush3.bf16.msra.mxu1 %v512_v14  ;;  %v400_v42 = vld [vmem:[%s711_s6] ss:$0 sm:$0xff]  ;;  %p524_p0 = scmp.ne.s32.totalorder %s375_s5, %s523_s4  ;;  %p529_p2 = scmp.lt.s32.totalorder %s523_s4, %s523_s4 }
  0x1d   :  { %468 = vmatprep.subr.bf16.mxu1 %v545_v1 }
  0x1e   :  { %451 = vmatpush3.bf16.msra.mxu0 %v506_v13  ;;  %p530_p3 = por %p529_p2, %p528_p1 }
  0x1f   :  { %476 = vmatprep.subr.bf16.mxu0 %v545_v1 }
  0x20   :  { %469 = vmatpush3.bf16.msra.mxu1 %v513_v16  ;;  %p531_p4 = pnand %p530_p3, %p524_p0 }
  0x21   :  { %453 = vmatmul.mubr.bf16.vlgmr.msra.gmra.mxu0 %v28_v15  ;;  %470 = vmatprep.subr.bf16.mxu1 %v545_v1 }
  0x22   :  { %492 = vmatprep.mubr.msk.bf16.mxu0 %vm546_vm0, %v545_v1  ;;  %477 = vmatpush3.bf16.msra.mxu0 %v515_v18 }
  0x23   :  { %478 = vmatprep.subr.bf16.mxu0 %v545_v1 }
  0x24   :  { %471 = vmatpush3.bf16.msra.mxu1 %v514_v17 }
  0x26   :  { %479 = vmatpush3.bf16.msra.mxu0 %v516_v19 }
  0x27   :  { %480 = vmatprep.subr.bf16.mxu0 %v545_v1 }
  0x2a   :  { %481 = vmatpush3.bf16.msra.mxu0 %v517_v20 }
  0x2b   :  { %482 = vmatprep.subr.bf16.mxu0 %v545_v1 }
  0x2e   :  { %483 = vmatpush3.bf16.msra.mxu0 %v518_v21 }
  0x2f   :  { %484 = vmatprep.subr.bf16.mxu0 %v545_v1 }
  0x32   :  { %485 = vmatpush3.bf16.msra.mxu0 %v519_v22 }
  0x33   :  { %486 = vmatprep.subr.bf16.mxu0 %v545_v1 }
  0x36   :  { %487 = vmatpush3.bf16.msra.mxu0 %v520_v23 }
  0x37   :  { %488 = vmatprep.subr.bf16.mxu0 %v545_v1 }
  0x3a   :  { %489 = vmatpush3.bf16.msra.mxu0 %v521_v32 }
  0x3b   :  { %490 = vmatprep.subr.bf16.mxu0 %v545_v1 }
  0x3e   :  { %491 = vmatpush3.bf16.msra.mxu0 %v522_v33 }
  0xe1   :  { %v134_v25 = vpop.f32.mrf.mxu0 }
  0xe2   :  { %v135_v26 = vadd.f32 %v382_v24, %v134_v25 }
  0xe3   :  { %v454_v27 = vpop.f32.mrf.mxu0 }
  0xe4   :  { %v140_v28 = vmax.f32 %v135_v26, 0.0 }
  0xe5   :  { %v137_v29 = vpop.f32.mrf.mxu0 }
  0xe6   :  { %v141_v30 = vpack.c.bf16 %v140_v28, %v140_v28 }
  0xe7   :  { %v455_v31 = vpop.f32.mrf.mxu0 }
  0xe8   :  { %473 = vmatmul.mubr.bf16.vlgmr.msra.gmra.mxu1 %v141_v30 }
 0x1a8   :  { %v247_v35 = vpop.f32.mrf.mxu1 }
 0x1a9   :  { %v248_v36 = vadd.f32 %v391_v34, %v247_v35 }
 0x1aa   :  { %v474_v37 = vpop.f32.mrf.mxu1 }
 0x1ab   :  { %v253_v38 = vmax.f32 %v248_v36, 0.0 }
 0x1ac   :  { %v250_v39 = vpop.f32.mrf.mxu1 }
 0x1ad   :  { %v254_v40 = vpack.c.bf16 %v253_v38, %v253_v38 }
 0x1ae   :  { %v475_v41 = vpop.f32.mrf.mxu1 }
 0x1af   :  { %493 = vmatmul.mubr.bf16.vlgmr.msra.gmra.mxu0 %v254_v40 }
 0x26f   :  { %v360_v43 = vpop.f32.mrf.mxu0 }
 0x270   :  { %v361_v44 = vadd.f32 %v400_v42, %v360_v43 }
 0x271   :  { %v494_v45 = vpop.f32.mrf.mxu0 }
 0x272   :  { %v366_v46 = vmax.f32 %v361_v44, 0.0 }
 0x273   :  { %v363_v47 = vpop.f32.mrf.mxu0 }
 0x274   :  { %367 = vst [vmem:[#allocation2] sm:$0xff] %v366_v46 }
 0x275   :  { %v495_v48 = vpop.f32.mrf.mxu0 }
 0x276   :  { %534 = shalt.err (!%p531_p4)
}
 0x277   :  { %377 = dma.vmem_to_hbm [thread:$0]  %s375_s5, 128, %s712_s7, [#allocation3]  }
 0x278   :  { %543 = dma.done.wait [#allocation3], 128  }
 0x279   :  { %544 = vsyncadd [#allocation3], 4294967168 }
 0x27a   :  { %381 = vsyncpa [#allocation3], 1 }

</bundles_post_ra>
